<compile_context>
chip_gen: v7x
topology: tpu7x:2x2x1
jax: 0.10.0
libtpu: 0.0.40
codegen_flags: <defaults>
</compile_context>

<pallas_src>
import functools

import jax
import jax.numpy as jnp
from jax import lax
from jax.experimental import pallas as pl
from jax.experimental.pallas import tpu as pltpu


def _round_up(x: int, m: int) -> int:
    return (x + m - 1) // m * m


def _text_embedding_kernel(ids_ref, table_ref, gamma_ref, beta_ref, out_ref,
                           gbuf_ref, sem_ref, *, seq_len: int, row_tile: int,
                           true_dim: int, eps: float):
    """Grid = (row_tiles,).

    ids_ref   : (rows_p*L,)         int32  SMEM (scalar prefetch) flattened token ids
    table_ref : (V, Dp)             f32    HBM (memory_space=pl.ANY) embedding table
    gamma_ref : (1, Dp)             f32    LN weight (zero-padded cols)
    beta_ref  : (1, Dp)             f32    LN bias   (zero-padded cols)
    out_ref   : (row_tile, Dp)      f32    per-sentence summed, layer-normed embeddings
    gbuf_ref  : (row_tile*L, Dp)    f32    VMEM scratch for the gathered rows
    sem_ref   : DMA semaphore (1,)
    """
    base = pl.program_id(0) * (row_tile * seq_len)
    n_tok = row_tile * seq_len
    sem = sem_ref.at[0]

    # --- issue all row-gather DMAs for this tile (fully overlapped) ----------------
    @pl.loop(0, n_tok)
    def _issue(t):
        tok = ids_ref[base + t]
        pltpu.make_async_copy(table_ref.at[pl.ds(tok, 1), :],
                              gbuf_ref.at[pl.ds(t, 1), :],
                              sem).start()

    # --- wait for every gather (each wait retires exactly one copy's signal) -------
    @pl.loop(0, n_tok)
    def _wait(t):
        pltpu.make_async_copy(table_ref.at[pl.ds(0, 1), :],
                              gbuf_ref.at[pl.ds(0, 1), :],
                              sem).wait()

    # --- LayerNorm over the true embedding dim (two-pass, column-masked) -----------
    emb = gbuf_ref[...]                                       # (n_tok, Dp) f32
    dp = emb.shape[-1]
    inv_d = 1.0 / true_dim
    if dp == true_dim:
        x = emb
        mean = jnp.sum(x, axis=-1, keepdims=True) * inv_d
        centered = x - mean
    else:
        col = lax.broadcasted_iota(jnp.int32, (1, dp), 1)
        mask = (col < true_dim).astype(jnp.float32)
        x = emb * mask                                        # robust even if pad cols != 0
        mean = jnp.sum(x, axis=-1, keepdims=True) * inv_d
        centered = (x - mean) * mask                          # padded cols contribute 0 to var
    var = jnp.sum(centered * centered, axis=-1, keepdims=True) * inv_d
    normed = centered * lax.rsqrt(var + eps)                  # (n_tok, Dp)

    # --- sum over tokens of each sentence; gamma/beta hoisted out of the token sum --
    summed = jnp.sum(normed.reshape(row_tile, seq_len, dp), axis=1)   # (row_tile, Dp)
    out_ref[...] = summed * gamma_ref[...] + float(seq_len) * beta_ref[...]


def text_embedding_forward(input_ids, table, gamma, beta, *, eps: float = 1e-12,
                           pad_token_id: int = 0, row_tile: int = 256):
    """input_ids: (B, S, L) int -> (B, S, D) float32 (SentenceMethod.SUM, eval mode)."""
    B, S, L = input_ids.shape
    V, D = table.shape
    rows = B * S

    # --- padded / tiled geometry -----------------------------------------------------
    Dp = _round_up(D, 128)                                  # lane-dense output (unmasked vst)
    # Gather buffer (row_tile*L, Dp) must fit VMEM on v7x (64 MiB): cap tokens per tile.
    token_budget = max(8, min(2048, (16 << 20) // (Dp * 4)))
    cap = max(8, (token_budget // max(L, 1)) // 8 * 8)
    rt = max(8, min(row_tile, cap, _round_up(rows, 8)))
    # Minimize row-padding waste among multiples of 8 <= rt (prefer the largest tile).
    best_pad, best_rt = None, rt
    t = rt
    while t >= 8:
        pad = _round_up(rows, t) - rows
        if best_pad is None or pad < best_pad:
            best_pad, best_rt = pad, t
        if pad == 0:
            break
        t -= 8
    row_tile = best_rt
    rows_p = _round_up(rows, row_tile)
    n_row_tiles = rows_p // row_tile

    # --- pad operands ------------------------------------------------------------------
    ids2d = input_ids.reshape(rows, L).astype(jnp.int32)
    if rows_p != rows:
        ids2d = jnp.pad(ids2d, ((0, rows_p - rows), (0, 0)), constant_values=pad_token_id)
    ids_flat = ids2d.reshape(rows_p * L)

    table_p = table.astype(jnp.float32)
    if Dp != D:
        table_p = jnp.pad(table_p, ((0, 0), (0, Dp - D)))
    gamma_p = jnp.pad(gamma.astype(jnp.float32).reshape(1, D), ((0, 0), (0, Dp - D)))
    beta_p = jnp.pad(beta.astype(jnp.float32).reshape(1, D), ((0, 0), (0, Dp - D)))

    kernel = functools.partial(_text_embedding_kernel, seq_len=L, row_tile=row_tile,
                               true_dim=D, eps=eps)

    # VMEM: gather buffer + double-buffered output + gamma/beta (tiny) + headroom.
    vmem_need = row_tile * L * Dp * 4 + 2 * row_tile * Dp * 4 + 8 * Dp * 4
    vmem_limit = int(min(60 << 20, max(32 << 20, 2 * vmem_need)))

    cost = pl.CostEstimate(
        flops=int(8 * rows_p * L * Dp),                      # LN + token sum (VPU work)
        transcendentals=int(rows_p * L),                     # rsqrt per token
        bytes_accessed=int(rows_p * L * 4                    # ids
                           + rows_p * L * Dp * 4             # gathered table rows
                           + rows_p * Dp * 4),               # output
    )

    out_p = pl.pallas_call(
        kernel,
        out_shape=jax.ShapeDtypeStruct((rows_p, Dp), jnp.float32),
        grid_spec=pltpu.PrefetchScalarGridSpec(
            num_scalar_prefetch=1,                           # flattened ids -> SMEM
            grid=(n_row_tiles,),
            in_specs=[
                pl.BlockSpec(memory_space=pl.ANY),                 # table stays in HBM
                pl.BlockSpec((1, Dp), lambda i, ids: (0, 0)),      # LN gamma
                pl.BlockSpec((1, Dp), lambda i, ids: (0, 0)),      # LN beta
            ],
            out_specs=pl.BlockSpec((row_tile, Dp), lambda i, ids: (i, 0)),
            scratch_shapes=[
                pltpu.VMEM((row_tile * L, Dp), jnp.float32),       # gathered rows
                pltpu.SemaphoreType.DMA((1,)),                     # gather completion sem
            ],
        ),
        compiler_params=pltpu.CompilerParams(
            dimension_semantics=("parallel",),
            vmem_limit_bytes=vmem_limit),
        cost_estimate=cost,
    )(ids_flat, table_p, gamma_p, beta_p)

    return out_p[:rows, :D].reshape(B, S, D)


def _reference(input_ids, table, gamma, beta, eps=1e-12):
    emb = table[input_ids]                                   # (B, S, L, D)
    mean = emb.mean(-1, keepdims=True)
    var = ((emb - mean) ** 2).mean(-1, keepdims=True)
    normed = (emb - mean) / jnp.sqrt(var + eps) * gamma + beta
    return normed.sum(axis=2)                                # SentenceMethod.SUM


if __name__ == "__main__":
    # Module hyper-parameters (small, consistent with the forward pass).
    embedding_dim = 32
    vocab_size = 64
    pad_token_id = 0
    eps = 1e-12

    B, S, L = 2, 4, 8                                        # batch, sentences, tokens

    key = jax.random.PRNGKey(0)
    k_tab, k_gamma, k_beta, k_ids = jax.random.split(key, 4)

    # Deterministic parameter init; padding row zeroed like nn.Embedding(padding_idx=...).
    table = jax.random.normal(k_tab, (vocab_size, embedding_dim), jnp.float32) * 0.02
    table = table.at[pad_token_id].set(0.0)
    gamma = 1.0 + 0.1 * jax.random.normal(k_gamma, (embedding_dim,), jnp.float32)
    beta = 0.1 * jax.random.normal(k_beta, (embedding_dim,), jnp.float32)

    input_ids = jax.random.randint(k_ids, (B, S, L), 0, vocab_size, jnp.int32)

    out = text_embedding_forward(input_ids, table, gamma, beta,
                                 eps=eps, pad_token_id=pad_token_id)
    out = jax.block_until_ready(out)

    ref = _reference(input_ids, table, gamma, beta, eps=eps)
    assert out.shape == (B, S, embedding_dim)
    assert jnp.allclose(out, ref, atol=1e-4, rtol=1e-4), float(jnp.abs(out - ref).max())

    print("KERNEL_OK")
</pallas_src>

<mosaic_0001>
module attributes {stable_mosaic.version = 11 : i64} {
  func.func @_text_embedding_kernel(%arg0: i32, %arg1: memref<64xi32, #tpu.memory_space<smem>>, %arg2: memref<64x128xf32, #tpu.memory_space<any>>, %arg3: memref<1x128xf32, #tpu.memory_space<vmem>>, %arg4: memref<1x128xf32, #tpu.memory_space<vmem>>, %arg5: memref<8x128xf32, #tpu.memory_space<vmem>>, %arg6: memref<64x128xf32, #tpu.memory_space<vmem>>, %arg7: memref<1x!tpu.dma_semaphore, #tpu.memory_space<semaphore_mem>>) attributes {dimension_semantics = [#tpu.dimension_semantics<parallel>], iteration_bounds = array<i64: 1>, scalar_prefetch = 1 : i64, scratch_operands = 2 : i64, tpu.core_type = #tpu.core_type<tc>, window_params = [{}, {pipeline_mode = #tpu.pipeline_mode<synchronous>, transform_indices = @transform_1, window_bounds = array<i64: 1, 128>}, {pipeline_mode = #tpu.pipeline_mode<synchronous>, transform_indices = @transform_2, window_bounds = array<i64: 1, 128>}, {transform_indices = @transform_3, window_bounds = array<i64: 8, 128>}]} {
    %c64_i32 = arith.constant 64 : i32
    %0 = arith.muli %arg0, %c64_i32 : i32
    %c0_i32 = arith.constant 0 : i32
    %c0_i32_0 = arith.constant 0 : i32
    %c64_i32_1 = arith.constant 64 : i32
    %1 = arith.addi %c0_i32_0, %c64_i32_1 : i32
    %c1_i32 = arith.constant 1 : i32
    scf.for %arg8 = %c0_i32_0 to %1 step %c1_i32  : i32 {
      %c1_i32_20 = arith.constant 1 : i32
      %40 = arith.muli %arg8, %c1_i32_20 : i32
      %c0_i32_21 = arith.constant 0 : i32
      %41 = arith.addi %c0_i32_21, %40 : i32
      %42 = arith.addi %0, %41 : i32
      %43 = arith.index_cast %42 : i32 to index
      %44 = memref.load %arg1[%43] : memref<64xi32, #tpu.memory_space<smem>>
      %c0_i32_22 = arith.constant 0 : i32
      %45 = tpu.memref_slice %arg2[%44, %c0_i32_22] : memref<64x128xf32, #tpu.memory_space<any>> -> memref<1x128xf32, #tpu.memory_space<any>>
      %c0_i32_23 = arith.constant 0 : i32
      %46 = tpu.memref_slice %arg6[%41, %c0_i32_23] : memref<64x128xf32, #tpu.memory_space<vmem>> -> memref<1x128xf32, #tpu.memory_space<vmem>>
      %47 = tpu.memref_slice %arg7[%c0_i32] : memref<1x!tpu.dma_semaphore, #tpu.memory_space<semaphore_mem>> -> memref<1x!tpu.dma_semaphore, #tpu.memory_space<semaphore_mem>>
      %48 = tpu.memref_squeeze %47 : memref<1x!tpu.dma_semaphore, #tpu.memory_space<semaphore_mem>> -> memref<!tpu.dma_semaphore, #tpu.memory_space<semaphore_mem>>
      tpu.enqueue_dma source(%45 : memref<1x128xf32, #tpu.memory_space<any>>) target(%46 : memref<1x128xf32, #tpu.memory_space<vmem>>) target_semaphore(%48 : memref<!tpu.dma_semaphore, #tpu.memory_space<semaphore_mem>>)
    }
    %c64_i32_2 = arith.constant 64 : i32
    %c0_i32_3 = arith.constant 0 : i32
    %c0_i32_4 = arith.constant 0 : i32
    %c64_i32_5 = arith.constant 64 : i32
    %2 = arith.addi %c0_i32_4, %c64_i32_5 : i32
    %c1_i32_6 = arith.constant 1 : i32
    scf.for %arg8 = %c0_i32_4 to %2 step %c1_i32_6  : i32 {
      %c0_i32_20 = arith.constant 0 : i32
      %c0_i32_21 = arith.constant 0 : i32
      %40 = tpu.memref_slice %arg2[%c0_i32_20, %c0_i32_21] : memref<64x128xf32, #tpu.memory_space<any>> -> memref<1x128xf32, #tpu.memory_space<any>>
      %c0_i32_22 = arith.constant 0 : i32
      %c0_i32_23 = arith.constant 0 : i32
      %41 = tpu.memref_slice %arg6[%c0_i32_22, %c0_i32_23] : memref<64x128xf32, #tpu.memory_space<vmem>> -> memref<1x128xf32, #tpu.memory_space<vmem>>
      %42 = tpu.memref_slice %arg7[%c0_i32_3] : memref<1x!tpu.dma_semaphore, #tpu.memory_space<semaphore_mem>> -> memref<1x!tpu.dma_semaphore, #tpu.memory_space<semaphore_mem>>
      %43 = tpu.memref_squeeze %42 : memref<1x!tpu.dma_semaphore, #tpu.memory_space<semaphore_mem>> -> memref<!tpu.dma_semaphore, #tpu.memory_space<semaphore_mem>>
      tpu.wait_dma2 semaphore(%43 : memref<!tpu.dma_semaphore, #tpu.memory_space<semaphore_mem>>) src(%40 : memref<1x128xf32, #tpu.memory_space<any>>) dst(%41 : memref<1x128xf32, #tpu.memory_space<vmem>>)
    }
    %c0 = arith.constant 0 : index
    %c0_7 = arith.constant 0 : index
    %3 = vector.load %arg6[%c0, %c0_7] : memref<64x128xf32, #tpu.memory_space<vmem>>, vector<64x128xf32>
    %4 = tpu.iota {dimensions = array<i32: 1>} : vector<1x128xi32>
    %c32_i32 = arith.constant 32 : i32
    %5 = vector.broadcast %c32_i32 : i32 to vector<1x128xi32>
    %6 = arith.cmpi slt, %4, %5 : vector<1x128xi32>
    %7 = arith.extui %6 : vector<1x128xi1> to vector<1x128xi32>
    %8 = arith.sitofp %7 : vector<1x128xi32> to vector<1x128xf32>
    %9 = vector.broadcast %8 : vector<1x128xf32> to vector<64x128xf32>
    %10 = arith.mulf %3, %9 : vector<64x128xf32>
    %cst = arith.constant dense<0.000000e+00> : vector<64xf32>
    %11 = vector.multi_reduction <add>, %10, %cst [1] : vector<64x128xf32> to vector<64xf32>
    %12 = vector.shape_cast %11 : vector<64xf32> to vector<64x1xf32>
    %cst_8 = arith.constant 3.125000e-02 : f32
    %13 = vector.broadcast %cst_8 : f32 to vector<64x1xf32>
    %14 = arith.mulf %12, %13 : vector<64x1xf32>
    %15 = vector.broadcast %14 : vector<64x1xf32> to vector<64x128xf32>
    %16 = arith.subf %10, %15 : vector<64x128xf32>
    %17 = vector.broadcast %8 : vector<1x128xf32> to vector<64x128xf32>
    %18 = arith.mulf %16, %17 : vector<64x128xf32>
    %19 = arith.mulf %18, %18 : vector<64x128xf32>
    %cst_9 = arith.constant dense<0.000000e+00> : vector<64xf32>
    %20 = vector.multi_reduction <add>, %19, %cst_9 [1] : vector<64x128xf32> to vector<64xf32>
    %21 = vector.shape_cast %20 : vector<64xf32> to vector<64x1xf32>
    %cst_10 = arith.constant 3.125000e-02 : f32
    %22 = vector.broadcast %cst_10 : f32 to vector<64x1xf32>
    %23 = arith.mulf %21, %22 : vector<64x1xf32>
    %cst_11 = arith.constant 9.99999996E-13 : f32
    %24 = vector.broadcast %cst_11 : f32 to vector<64x1xf32>
    %25 = arith.addf %23, %24 : vector<64x1xf32>
    %26 = math.rsqrt %25 : vector<64x1xf32>
    %27 = vector.broadcast %26 : vector<64x1xf32> to vector<64x128xf32>
    %28 = arith.mulf %18, %27 : vector<64x128xf32>
    %29 = vector.shape_cast %28 : vector<64x128xf32> to vector<8x8x128xf32>
    %cst_12 = arith.constant dense<0.000000e+00> : vector<8x128xf32>
    %30 = vector.multi_reduction <add>, %29, %cst_12 [1] : vector<8x8x128xf32> to vector<8x128xf32>
    %c0_13 = arith.constant 0 : index
    %c0_14 = arith.constant 0 : index
    %31 = vector.load %arg3[%c0_13, %c0_14] : memref<1x128xf32, #tpu.memory_space<vmem>>, vector<1x128xf32>
    %32 = vector.broadcast %31 : vector<1x128xf32> to vector<8x128xf32>
    %33 = arith.mulf %30, %32 : vector<8x128xf32>
    %c0_15 = arith.constant 0 : index
    %c0_16 = arith.constant 0 : index
    %34 = vector.load %arg4[%c0_15, %c0_16] : memref<1x128xf32, #tpu.memory_space<vmem>>, vector<1x128xf32>
    %cst_17 = arith.constant 8.000000e+00 : f32
    %35 = vector.broadcast %cst_17 : f32 to vector<1x128xf32>
    %36 = arith.mulf %35, %34 : vector<1x128xf32>
    %37 = vector.broadcast %36 : vector<1x128xf32> to vector<8x128xf32>
    %38 = arith.addf %33, %37 : vector<8x128xf32>
    %c0_18 = arith.constant 0 : index
    %c0_19 = arith.constant 0 : index
    %39 = vector.load %arg5[%c0_18, %c0_19] : memref<8x128xf32, #tpu.memory_space<vmem>>, vector<8x128xf32>
    tpu.vector_store %arg5[%c0_18, %c0_19], %38 {strides = array<i32>} : memref<8x128xf32, #tpu.memory_space<vmem>>, vector<8x128xf32>,
    return
  }
  func.func @transform_1(%arg0: i32, %arg1: memref<64xi32, #tpu.memory_space<smem>>) -> (i32, i32) {
    %c0_i32 = arith.constant 0 : i32
    %c0_i32_0 = arith.constant 0 : i32
    %c0_i32_1 = arith.constant 0 : i32
    return %c0_i32, %c0_i32_0 : i32, i32
  }
  func.func @transform_2(%arg0: i32, %arg1: memref<64xi32, #tpu.memory_space<smem>>) -> (i32, i32) {
    %c0_i32 = arith.constant 0 : i32
    %c0_i32_0 = arith.constant 0 : i32
    %c0_i32_1 = arith.constant 0 : i32
    return %c0_i32, %c0_i32_0 : i32, i32
  }
  func.func @transform_3(%arg0: i32, %arg1: memref<64xi32, #tpu.memory_space<smem>>) -> (i32, i32) {
    %c0_i32 = arith.constant 0 : i32
    %c0_i32_0 = arith.constant 0 : i32
    return %arg0, %c0_i32 : i32, i32
  }
}

</mosaic_0001>

<bundles_post_ra>
// kernel: tpu_custom_call.1
= control target key start
LH: loop header
LB: loop body
LE: loop exit
PB: predicated region body
PF: predicated region fallthrough
CT: control target
= control target key end

     0   :  { %s575_s0 = inlined_call_operand.hbm [shape: s32[64], index: 0, kind: input, shape index: {}]   ;;  %s576_s1 = inlined_call_operand.hbm [shape: f32[64,128], index: 1, kind: input, shape index: {}]   ;;  %s577_s2 = inlined_call_operand.vmem [shape: f32[1,128], index: 2, kind: input, shape index: {}]   ;;  %s578_s3 = inlined_call_operand.vmem [shape: f32[1,128], index: 3, kind: input, shape index: {}]   ;;  %s579_s4 = inlined_call_operand.hbm [shape: f32[8,128], index: 4, kind: output, shape index: {}]  }
   0x1   :  { %s349_s17 = scalar_lea.hbm %s575_s0, 16 }
   0x2   :  { %p350_p0 = scmp.ne.s32.totalorder %s575_s0, %s349_s17  ;;  %p353_p1 = scmp.lt.u32.totalorder %s349_s17, %s575_s0 }
   0x4   :  { %p355_p2 = pnand %p353_p1, %p350_p0 }
   0x6   :  { %358 = shalt.err (!%p355_p2)  }
   0x7   :  { %s427_s22 = smov [#allocation5]  }
   0x8   :  { %10 = dma.hbm_to_smem %s575_s0, 16, %s427_s22, [#allocation4] }
   0x9   :  { %413 = dma.done.wait [#allocation4], 16 }
   0xa   :  { %414 = vsyncadd [#allocation4], 4294967280 }
   0xb   :  { %12 = sfence }
   0xc   :  { %13 = vsyncpa [#allocation7], 0  ;;  %s468_s25 = smov 0  }
   0xd LB: > { %s26_s26 = sld [smem:[#allocation5 + %s421_s25]]  ;;  %s29_s27 = scalar_lea.vmem [#allocation2], %s421_s25  ;;  %s421_s25 = sphi %s468_s25, %s24_s25  }
   0xe   : > { %s37_s28 = sshll.u32 %s29_s27, 4  ;;  %s361_s9 = scalar_lea.hbm %s576_s1, 1024  ;;  %s38_s28 = int_to_ptr.vmem [resolvable:$true] %s37_s28 }
  0x13   : > { %s310_s29 = sshll.u32 %s26_s26, 4 }
  0x14   : > { %s28_s5 = scalar_lea.hbm %s576_s1, %s310_s29 }
  0x15   : > { %s359_s6 = scalar_lea.hbm %s28_s5, 16  ;;  %p362_p4 = scmp.lt.u32.totalorder %s28_s5, %s576_s1 }
  0x16   : > { %p360_p3 = scmp.ne.s32.totalorder %s28_s5, %s359_s6  ;;  %p363_p5 = scmp.lt.u32.totalorder %s361_s9, %s359_s6 }
  0x17   : > { %p365_p7 = scmp.lt.u32.totalorder %s359_s6, %s28_s5 }
  0x18   : > { %p364_p6 = por %p363_p5, %p362_p4 }
  0x1a   : > { %p366_p8 = por %p365_p7, %p364_p6 }
  0x1c   : > { %p367_p9 = pnand %p366_p8, %p360_p3 }
  0x1e   : > { %370 = shalt.err (!%p367_p9)  }
  0x1f   : > { %s371_s12 = scalar_lea.vmem %s38_s28, 16  ;;  %s428_s13 = smov [#allocation2]  }
  0x20   : > { %p372_p10 = scmp.ne.s32.totalorder %s38_s28, %s371_s12  ;;  %s373_s14 = sshll.u32 %s428_s13, 4  ;;  %s374_s14 = int_to_ptr.vmem [resolvable:$false] %s373_s14 }
  0x21   : > { %s375_s15 = scalar_lea.vmem %s374_s14, 1024  ;;  %p376_p11 = scmp.lt.s32.totalorder %s38_s28, %s374_s14 }
  0x22   : > { %p377_p12 = scmp.lt.s32.totalorder %s375_s15, %s371_s12 }
  0x24   : > { %p378_p13 = por %p377_p12, %p376_p11 }
  0x26   : > { %p379_p0 = pnand %p378_p13, %p372_p10 }
  0x28   : > { %382 = shalt.err (!%p379_p0)  }
  0x29   : > { %40 = dma.hbm_to_vmem [thread:$0]  %s28_s5, 16, %s38_s28, [#allocation3] }
  0x2a   : > { %s24_s25 = sadd.s32 1, %s421_s25  }
  0x2b   : > { %p21_p1 = scmp.ge.s32.totalorder %s24_s25, 64  }
  0x2c   :  { %s423_s16 = smov (%p21_p1), 0  }
  0x2d   :  { %23 = sbr.rel (!%p21_p1) target bundleno = 13 (0xd), region = 48 }
  0x34 LB: > { %415 = dma.done.wait [#allocation3], 16  ;;  %s425_s16 = sphi %s423_s16, %s46_s16  }
  0x35   : > { %416 = vsyncadd [#allocation3], 4294967280  ;;  %s46_s16 = sadd.s32 1, %s425_s16  }
  0x36   : > { %p43_p2 = scmp.ge.s32.totalorder %s46_s16, 64  }
  0x37   :  { %v58_v0 = vlaneseq (%p43_p2)  ;;  %v51_v2 = vld [vmem:[#allocation2 + $0x8] sm:$0xff] (%p43_p2)  ;;  %v50_v3 = vld [vmem:[#allocation2] sm:$0xff] (%p43_p2)  ;;  %v429_v4 = vmov (%p43_p2), 0.0   ;;  %v52_v6 = vld [vmem:[#allocation2 + $0x10] sm:$0xff] (%p43_p2)  ;;  %vm255_vm1 = vcmask (%p43_p2), 1041409   ;;  %vm258_vm2 = vcmask (%p43_p2), 1042434  }
  0x38   :  { %45 = sbr.rel (!%p43_p2) target bundleno = 52 (0x34), region = 59  ;;  %v53_v7 = vld [vmem:[#allocation2 + $0x18] sm:$0xff] (%p43_p2)  ;;  %v54_v12 = vld [vmem:[#allocation2 + $0x20] sm:$0xff] (%p43_p2)  ;;  %v55_v13 = vld [vmem:[#allocation2 + $0x28] sm:$0xff] (%p43_p2)  ;;  %vm261_vm3 = vcmask (%p43_p2), 1043459   ;;  %vm264_vm4 = vcmask (%p43_p2), 1044484  }
  0x39   :  { %v59_v1 = vand.u32 (%p43_p2), 127, %v58_v0  ;;  %v56_v16 = vld [vmem:[#allocation2 + $0x30] sm:$0xff] (%p43_p2)  ;;  %v57_v17 = vld [vmem:[#allocation2 + $0x38] sm:$0xff] (%p43_p2)  ;;  %vm267_vm5 = vcmask (%p43_p2), 1045509   ;;  %vm270_vm6 = vcmask (%p43_p2), 1046534   ;;  %vm273_vm7 = vcmask (%p43_p2), 1047559  }
  0x3b   :  { %vm60_vm0 = vcmp.lt.s32.totalorder (%p43_p2), %v59_v1, 32 }
  0x3c   :  { %v488_v5 = vsel (%p43_p2), %vm60_vm0, 1.0, %v429_v4 }
  0x3d   :  { %v64_v8 = vmul.f32 (%p43_p2), %v488_v5, %v51_v2  ;;  %v63_v9 = vmul.f32 (%p43_p2), %v488_v5, %v50_v3  ;;  %v65_v10 = vmul.f32 (%p43_p2), %v488_v5, %v52_v6  ;;  %v66_v11 = vmul.f32 (%p43_p2), %v488_v5, %v53_v7 }
  0x3e   :  { %v67_v14 = vmul.f32 (%p43_p2), %v488_v5, %v54_v12  ;;  %v68_v15 = vmul.f32 (%p43_p2), %v488_v5, %v55_v13  ;;  %v69_v18 = vmul.f32 (%p43_p2), %v488_v5, %v56_v16  ;;  %v70_v19 = vmul.f32 (%p43_p2), %v488_v5, %v57_v17 }
  0x3f   :  { %73 = vadd.xlane.f32.xlu0 %v64_v8  ;;  %71 = vadd.xlane.f32.xlu1 %v63_v9 }
  0x43   :  { %75 = vadd.xlane.f32.xlu0 %v65_v10  ;;  %77 = vadd.xlane.f32.xlu1 %v66_v11 }
  0x47   :  { %79 = vadd.xlane.f32.xlu0 %v67_v14  ;;  %81 = vadd.xlane.f32.xlu1 %v68_v15 }
  0x4b   :  { %83 = vadd.xlane.f32.xlu0 %v69_v18  ;;  %85 = vadd.xlane.f32.xlu1 %v70_v19 }
  0xcc   :  { %v74_v20 = vpop.xlane.xlu0 %73  ;;  %v72_v21 = vpop.xlane.xlu1 %71 }
  0xcd   :  { %v88_v22 = vmul.f32 0.03125, %v74_v20  ;;  %v87_v23 = vmul.f32 0.03125, %v72_v21 }
  0xcf   :  { %v96_v24 = vsub.f32 %v64_v8, %v88_v22  ;;  %v95_v25 = vsub.f32 %v63_v9, %v87_v23 }
  0xd0   :  { %v76_v26 = vpop.xlane.xlu0 %75  ;;  %v78_v27 = vpop.xlane.xlu1 %77 }
  0xd1   :  { %v89_v28 = vmul.f32 0.03125, %v76_v26  ;;  %v90_v29 = vmul.f32 0.03125, %v78_v27  ;;  %v499_v30 = vmul.f32 %v488_v5, %v96_v24  ;;  %v502_v31 = vmul.f32 %v488_v5, %v95_v25 }
  0xd3   :  { %v97_v32 = vsub.f32 %v65_v10, %v89_v28  ;;  %v98_v33 = vsub.f32 %v66_v11, %v90_v29  ;;  %v112_v34 = vmul.f32 %v499_v30, %v499_v30  ;;  %v111_v37 = vmul.f32 %v502_v31, %v502_v31 }
  0xd4   :  { %v80_v35 = vpop.xlane.xlu0 %79  ;;  %v82_v36 = vpop.xlane.xlu1 %81 }
  0xd5   :  { %v91_v38 = vmul.f32 0.03125, %v80_v35  ;;  %121 = vadd.xlane.f32.xlu0 %v112_v34  ;;  %v92_v39 = vmul.f32 0.03125, %v82_v36  ;;  %v509_v40 = vmul.f32 %v488_v5, %v97_v32  ;;  %v512_v41 = vmul.f32 %v488_v5, %v98_v33 }
  0xd6   :  { %v234_v33 = vshrl.u32 %v58_v0, 7  ;;  %v550_v0 = vld [vmem:[%s577_s2] ss:$0 sm:$0xff]  ;;  %s430_s2 = smov [#allocation6]  }
  0xd7   :  { %v99_v42 = vsub.f32 %v67_v14, %v91_v38  ;;  %v100_v43 = vsub.f32 %v68_v15, %v92_v39  ;;  %v113_v44 = vmul.f32 %v509_v40, %v509_v40  ;;  %v114_v47 = vmul.f32 %v512_v41, %v512_v41  ;;  %s283_s19 = sshll.u32 %s430_s2, 4  ;;  %s284_s19 = int_to_ptr.vmem [resolvable:$true] %s283_s19 }
  0xd8   :  { %v84_v45 = vpop.xlane.xlu0 %83  ;;  %v86_v46 = vpop.xlane.xlu1 %85  ;;  %s383_s20 = scalar_lea.vmem %s284_s19, 128  ;;  %p388_p4 = scmp.lt.s32.totalorder %s284_s19, %s284_s19 }
  0xd9   :  { %v93_v48 = vmul.f32 0.03125, %v84_v45  ;;  %123 = vadd.xlane.f32.xlu1 %v113_v44  ;;  %119 = vadd.xlane.f32.xlu0 %v111_v37  ;;  %v94_v49 = vmul.f32 0.03125, %v86_v46  ;;  %v519_v50 = vmul.f32 %v488_v5, %v99_v42  ;;  %v522_v51 = vmul.f32 %v488_v5, %v100_v43  ;;  %p384_p3 = scmp.ne.s32.totalorder %s284_s19, %s383_s20  ;;  %p389_p5 = scmp.lt.s32.totalorder %s383_s20, %s383_s20 }
  0xda   :  { %v235_v46 = vsub.s32 0, %v234_v33 }
  0xdb   :  { %v101_v52 = vsub.f32 %v69_v18, %v93_v48  ;;  %v102_v53 = vsub.f32 %v70_v19, %v94_v49  ;;  %v115_v54 = vmul.f32 %v519_v50, %v519_v50  ;;  %v116_v56 = vmul.f32 %v522_v51, %v522_v51  ;;  %p390_p6 = por %p389_p5, %p388_p4 }
  0xdd   :  { %127 = vadd.xlane.f32.xlu0 %v115_v54  ;;  %125 = vadd.xlane.f32.xlu1 %v114_v47  ;;  %v527_v55 = vmul.f32 %v488_v5, %v101_v52  ;;  %v532_v57 = vmul.f32 %v488_v5, %v102_v53  ;;  %p391_p7 = pnand %p390_p6, %p384_p3 }
  0xdf   :  { %v117_v58 = vmul.f32 %v527_v55, %v527_v55  ;;  %v118_v59 = vmul.f32 %v532_v57, %v532_v57 }
  0xe1   :  { %131 = vadd.xlane.f32.xlu0 %v117_v58  ;;  %129 = vadd.xlane.f32.xlu1 %v116_v56 }
  0xe5   :  { %133 = vadd.xlane.f32.xlu1 %v118_v59 }
 0x162   :  { %v122_v60 = vpop.xlane.xlu0 %121 }
 0x163   :  { %v136_v61 = vmul.f32 0.03125, %v122_v60 }
 0x165   :  { %v144_v62 = vadd.f32 1e-12, %v136_v61 }
 0x166   :  { %v120_v63 = vpop.xlane.xlu0 %119  ;;  %v124_v1 = vpop.xlane.xlu1 %123 }
 0x167   :  { %333 = vrsqrt.f32 %v144_v62  ;;  %v135_v2 = vmul.f32 0.03125, %v120_v63  ;;  %v137_v3 = vmul.f32 0.03125, %v124_v1 }
 0x169   :  { %v143_v4 = vadd.f32 1e-12, %v135_v2  ;;  %v145_v5 = vadd.f32 1e-12, %v137_v3 }
 0x16a   :  { %v128_v6 = vpop.xlane.xlu0 %127  ;;  %v126_v7 = vpop.xlane.xlu1 %125 }
 0x16b   :  { %335 = vrsqrt.f32 %v143_v4  ;;  %v139_v8 = vmul.f32 0.03125, %v128_v6  ;;  %v138_v9 = vmul.f32 0.03125, %v126_v7 }
 0x16c   :  { %337 = vrsqrt.f32 %v145_v5 }
 0x16d   :  { %v147_v10 = vadd.f32 1e-12, %v139_v8  ;;  %v146_v11 = vadd.f32 1e-12, %v138_v9 }
 0x16e   :  { %v132_v12 = vpop.xlane.xlu0 %131  ;;  %v130_v13 = vpop.xlane.xlu1 %129 }
 0x16f   :  { %339 = vrsqrt.f32 %v147_v10  ;;  %v141_v14 = vmul.f32 0.03125, %v132_v12  ;;  %v140_v15 = vmul.f32 0.03125, %v130_v13 }
 0x170   :  { %341 = vrsqrt.f32 %v146_v11 }
 0x171   :  { %v334_v16 = vpop.eup %333  ;;  %v149_v17 = vadd.f32 1e-12, %v141_v14  ;;  %v148_v18 = vadd.f32 1e-12, %v140_v15 }
 0x172   :  { %v160_v19 = vmul.f32 %v334_v16, %v499_v30  ;;  %v134_v20 = vpop.xlane.xlu1 %133  ;;  %v230_v30 = vld [vmem:[%s578_s3] sm:$0x1] }
 0x173   :  { %343 = vrsqrt.f32 %v149_v17  ;;  %v142_v21 = vmul.f32 0.03125, %v134_v20 }
 0x174   :  { %v173_v22 = vrot.slane %v160_v19, 4  ;;  %345 = vrsqrt.f32 %v148_v18 }
 0x175   :  { %v336_v23 = vpop.eup %335  ;;  %v150_v24 = vadd.f32 1e-12, %v142_v21 }
 0x176   :  { %v338_v25 = vpop.eup %337  ;;  %v174_v26 = vadd.f32 %v173_v22, %v160_v19  ;;  %v159_v27 = vmul.f32 %v336_v23, %v502_v31 }
 0x177   :  { %v161_v28 = vmul.f32 %v338_v25, %v509_v40  ;;  %347 = vrsqrt.f32 %v150_v24  ;;  %v231_v40 = vmul.f32 8.0, %v230_v30 }
 0x178   :  { %v175_v29 = vrot.slane %v174_v26, 2  ;;  %v167_v32 = vrot.slane %v159_v27, 4 }
 0x179   :  { %v340_v34 = vpop.eup %339  ;;  %v179_v35 = vrot.slane %v161_v28, 4  ;;  %v236_v63 = vrot.slane %v231_v40, %v235_v46 }
 0x17a   :  { %v342_v36 = vpop.eup %341  ;;  %v176_v37 = vadd.f32 %v175_v29, %v174_v26  ;;  %v168_v38 = vadd.f32 %v167_v32, %v159_v27  ;;  %v163_v39 = vmul.f32 %v340_v34, %v519_v50 }
 0x17b   :  { %v180_v42 = vadd.f32 %v179_v35, %v161_v28  ;;  %v162_v31 = vmul.f32 %v342_v36, %v512_v41 }
 0x17c   :  { %v177_v43 = vrot.slane %v176_v37, 1  ;;  %v169_v44 = vrot.slane %v168_v38, 2  ;;  %v191_v45 = vrot.slane %v163_v39, 4 }
 0x17d   :  { %v344_v47 = vpop.eup %343  ;;  %v181_v48 = vrot.slane %v180_v42, 2  ;;  %v185_v49 = vrot.slane %v162_v31, 4 }
 0x17e   :  { %v346_v52 = vpop.eup %345  ;;  %v178_v53 = vadd.f32 %v177_v43, %v176_v37  ;;  %v170_v54 = vadd.f32 %v169_v44, %v168_v38  ;;  %v192_v50 = vadd.f32 %v191_v45, %v163_v39  ;;  %v165_v56 = vmul.f32 %v344_v47, %v527_v55 }
 0x17f   :  { %v182_v41 = vadd.f32 %v181_v48, %v180_v42  ;;  %v186_v58 = vadd.f32 %v185_v49, %v162_v31  ;;  %v164_v59 = vmul.f32 %v346_v52, %v522_v51 }
 0x180   :  { %v171_v60 = vrot.slane %v170_v54, 1  ;;  %v193_v61 = vrot.slane %v192_v50, 2  ;;  %v203_v62 = vrot.slane %v165_v56, 4  ;;  %v223_v2 = vmul.f32 %v550_v0, %v178_v53 }
 0x181   :  { %v348_v1 = vpop.eup %347  ;;  %v183_v3 = vrot.slane %v182_v41, 1  ;;  %v187_v4 = vrot.slane %v186_v58, 2  ;;  %v197_v5 = vrot.slane %v164_v59, 4 }
 0x182   :  { %v172_v6 = vadd.f32 %v171_v60, %v170_v54  ;;  %v194_v7 = vadd.f32 %v193_v61, %v192_v50  ;;  %v204_v8 = vadd.f32 %v203_v62, %v165_v56  ;;  %v166_v9 = vmul.f32 %v348_v1, %v532_v57 }
 0x183   :  { %v184_v55 = vadd.f32 %v183_v3, %v182_v41  ;;  %v188_v10 = vadd.f32 %v187_v4, %v186_v58  ;;  %v198_v11 = vadd.f32 %v197_v5, %v164_v59  ;;  %v239_v18 = vadd.f32 %v236_v63, %v223_v2 }
 0x184   :  { %v222_v51 = vmul.f32 %v550_v0, %v172_v6  ;;  %v205_v12 = vrot.slane %v204_v8, 2  ;;  %v209_v13 = vrot.slane %v166_v9, 4  ;;  %v195_v14 = vrot.slane %v194_v7, 1 }
 0x185   :  { %v189_v15 = vrot.slane %v188_v10, 1  ;;  %v199_v16 = vrot.slane %v198_v11, 2  ;;  %v224_v17 = vmul.f32 %v550_v0, %v184_v55  ;;  %v254_v32 = vrot.slane %v239_v18, 7 }
 0x186   :  { %v196_v19 = vadd.f32 %v195_v14, %v194_v7  ;;  %v206_v20 = vadd.f32 %v205_v12, %v204_v8  ;;  %v210_v21 = vadd.f32 %v209_v13, %v166_v9  ;;  %v238_v24 = vadd.f32 %v236_v63, %v222_v51 }
 0x187   :  { %v190_v22 = vadd.f32 %v189_v15, %v188_v10  ;;  %v200_v23 = vadd.f32 %v199_v16, %v198_v11  ;;  %v240_v57 = vadd.f32 %v236_v63, %v224_v17 }
 0x188   :  { %v207_v25 = vrot.slane %v206_v20, 1  ;;  %v211_v26 = vrot.slane %v210_v21, 2  ;;  %v226_v27 = vmul.f32 %v550_v0, %v196_v19  ;;  %v256_v38 = vsel %vm255_vm1, %v254_v32, %v238_v24 }
 0x189   :  { %v201_v28 = vrot.slane %v200_v23, 1  ;;  %v225_v29 = vmul.f32 %v550_v0, %v190_v22  ;;  %v257_v35 = vrot.slane %v240_v57, 6 }
 0x18a   :  { %v208_v30 = vadd.f32 %v207_v25, %v206_v20  ;;  %v212_v33 = vadd.f32 %v211_v26, %v210_v21  ;;  %v242_v34 = vadd.f32 %v236_v63, %v226_v27 }
 0x18b   :  { %v202_v36 = vadd.f32 %v201_v28, %v200_v23  ;;  %v241_v37 = vadd.f32 %v236_v63, %v225_v29  ;;  %v259_v45 = vsel %vm258_vm2, %v257_v35, %v256_v38 }
 0x18c   :  { %v213_v39 = vrot.slane %v212_v33, 1  ;;  %v228_v42 = vmul.f32 %v550_v0, %v208_v30  ;;  %v263_v46 = vrot.slane %v242_v34, 4 }
 0x18d   :  { %v227_v31 = vmul.f32 %v550_v0, %v202_v36  ;;  %v260_v40 = vrot.slane %v241_v37, 5 }
 0x18e   :  { %v214_v43 = vadd.f32 %v213_v39, %v212_v33  ;;  %v244_v44 = vadd.f32 %v236_v63, %v228_v42 }
 0x18f   :  { %v243_v47 = vadd.f32 %v236_v63, %v227_v31  ;;  %v262_v48 = vsel %vm261_vm3, %v260_v40, %v259_v45 }
 0x190   :  { %v229_v49 = vmul.f32 %v550_v0, %v214_v43  ;;  %v269_v53 = vrot.slane %v244_v44, 2  ;;  %v265_v50 = vsel %vm264_vm4, %v263_v46, %v262_v48 }
 0x191   :  { %v266_v52 = vrot.slane %v243_v47, 3 }
 0x192   :  { %v245_v54 = vadd.f32 %v236_v63, %v229_v49 }
 0x193   :  { %v268_v56 = vsel %vm267_vm5, %v266_v52, %v265_v50 }
 0x194   :  { %v272_v41 = vrot.slane %v245_v54, 1  ;;  %v271_v58 = vsel %vm270_vm6, %v269_v53, %v268_v56 }
 0x196   :  { %v274_v59 = vsel %vm273_vm7, %v272_v41, %v271_v58 }
 0x197   :  { %276 = vst [vmem:[#allocation6] sm:$0xff] %v274_v59 }
 0x198   :  { %394 = shalt.err (!%p391_p7)
}
 0x199   :  { %s395_s23 = scalar_lea.hbm %s579_s4, 128 }
 0x19a   :  { %p396_p8 = scmp.ne.s32.totalorder %s579_s4, %s395_s23  ;;  %p399_p9 = scmp.lt.u32.totalorder %s395_s23, %s579_s4 }
 0x19c   :  { %p401_p10 = pnand %p399_p9, %p396_p8 }
 0x19e   :  { %404 = shalt.err (!%p401_p10)
}
 0x19f   :  { %286 = dma.vmem_to_hbm [thread:$0]  %s284_s19, 128, %s579_s4, [#allocation7]  }
 0x1a0   :  { %417 = dma.done.wait [#allocation7], 128  }
 0x1a1   :  { %418 = vsyncadd [#allocation7], 4294967168 }
 0x1a2   :  { %290 = vsyncpa [#allocation7], 1 }
 0x1a3   :  { %291 = vsyncmov [#allocation3] }
 0x1a6   :  { %s292_s30 = vpop.sfrf %291 }
 0x1a7   :  { %p313_p11 = scmp.ne.s32.totalorder %s292_s30, 0 }
 0x1a9   :  { %296 = shalt.err (%p313_p11)  }

</bundles_post_ra>
